<compile_context>
chip_gen: v7x
topology: tpu7x:2x2x1
jax: 0.10.0
libtpu: 0.0.40
codegen_flags: <defaults>
</compile_context>

<pallas_src>
import functools

import jax
import jax.numpy as jnp
from jax.experimental import pallas as pl
from jax.experimental.pallas import tpu as pltpu

_EPS = 1e-7
_LANE = 128
_SUBLANE = 8
_TILE_BYTES = 2 * 1024 * 1024          # per-tile byte budget (in input dtype)
_SMALL_LIMIT_BYTES = 2 * 1024 * 1024   # single-pass fast-path threshold
_VMEM_LIMIT_BYTES = 32 * 1024 * 1024   # safe scoped-VMEM request on all gens


def _finalize(finite_sum, finite_sumsq, finite_min, k, *, n, scale):
    """(1,1) partial stats -> (alpha, beta, fill_out) with
    out = where(x == -inf, fill_out, x * alpha + beta)."""
    nf = jnp.float32(n)
    inv_n = jnp.float32(1.0 / n)
    inv_nm1 = jnp.float32(1.0 / (n - 1)) if n > 1 else jnp.float32(jnp.nan)
    fill = jnp.where(k < nf, finite_min, jnp.float32(0.0))
    total_sum = finite_sum + k * fill              # fold the -inf fill back in
    total_sumsq = finite_sumsq + k * fill * fill
    mean = total_sum * inv_n
    # TODO(synk): one-pass E[x^2] - mean^2 can cancel badly when |mean| >> std.
    var = jnp.maximum(total_sumsq - nf * mean * mean, 0.0) * inv_nm1
    std = jnp.sqrt(var)                            # unbiased, like torch.std
    alpha = jnp.float32(scale) / (std + jnp.float32(_EPS))
    beta = -mean * alpha
    fill_out = (fill - mean) * alpha
    return alpha, beta, fill_out


# ----------------------------------------------------------------------------
# Pass 1: per-(sublane, lane) partial statistics, 2-core parallel.
# ----------------------------------------------------------------------------
def _stats_kernel(x_ref, sum_ref, sumsq_ref, min_ref, cnt_ref, *,
                  n_valid, tile_rows, tiles_per_core, num_tiles, has_edge):
    i = pl.program_id(1)

    @pl.when(i == 0)
    def _init():
        sum_ref[...] = jnp.zeros_like(sum_ref)
        sumsq_ref[...] = jnp.zeros_like(sumsq_ref)
        min_ref[...] = jnp.full_like(min_ref, jnp.inf)
        cnt_ref[...] = jnp.zeros_like(cnt_ref)

    x = x_ref[...].astype(jnp.float32)             # (tile_rows, 128) in-register
    t, lanes = x.shape
    shp = (t // _SUBLANE, _SUBLANE, lanes)
    neg_inf = x == -jnp.inf

    def accumulate(drop, kc_mask):
        # Pure-VPU accumulation into resident (1,8,128) partials; the cross-lane
        # collapse happens once, in the normalize pass, on 8 KiB of data.
        xf = jnp.where(drop, 0.0, x)               # finite values, 0 elsewhere
        xm = jnp.where(drop, jnp.inf, x)           # finite values, +inf elsewhere
        sum_ref[...] += jnp.sum(xf.reshape(shp), axis=0)
        sumsq_ref[...] += jnp.sum((xf * xf).reshape(shp), axis=0)
        min_ref[...] = jnp.minimum(min_ref[...], jnp.min(xm.reshape(shp), axis=0))
        cnt_ref[...] += jnp.sum(kc_mask.astype(jnp.float32).reshape(shp), axis=0)

    if not has_edge:
        accumulate(neg_inf, neg_inf)
        return

    logical = pl.program_id(0) * tiles_per_core + i    # logical tile index
    is_edge = logical >= num_tiles - 1                 # edge or phantom tile

    @pl.when(jnp.logical_not(is_edge))
    def _full_tile():
        accumulate(neg_inf, neg_inf)

    @pl.when(is_edge)
    def _edge_tile():
        # Mask the ragged tail / OOB rows and whole phantom tiles.  The DMA tile
        # index is clamped in the index_map, so data read here is always valid
        # (possibly duplicate) — the mask guarantees it contributes nothing.
        flat = (jax.lax.broadcasted_iota(jnp.int32, (t, lanes), 0)
                + logical * tile_rows) * lanes \
               + jax.lax.broadcasted_iota(jnp.int32, (t, lanes), 1)
        valid = flat < n_valid
        drop = jnp.logical_or(neg_inf, jnp.logical_not(valid))
        accumulate(drop, jnp.logical_and(neg_inf, valid))


# ----------------------------------------------------------------------------
# Pass 2: finalize (fused, per-step) + normalize, parallel over tiles.
# ----------------------------------------------------------------------------
def _normalize_kernel(sum_ref, sumsq_ref, min_ref, cnt_ref, x_ref, o_ref, *,
                      n, scale):
    def collapse(ref, op):
        return op(ref[...].reshape(-1, _LANE), keepdims=True)     # -> (1, 1)

    alpha, beta, fill_out = _finalize(
        collapse(sum_ref, jnp.sum), collapse(sumsq_ref, jnp.sum),
        collapse(min_ref, jnp.min), collapse(cnt_ref, jnp.sum),
        n=n, scale=scale)
    x = x_ref[...].astype(jnp.float32)
    o_ref[...] = jnp.where(x == -jnp.inf, fill_out,
                           x * alpha + beta).astype(o_ref.dtype)


# ----------------------------------------------------------------------------
# Single-pass fast path: whole slab resident in VMEM.
# ----------------------------------------------------------------------------
def _fused_small_kernel(x_ref, o_ref, *, n, scale, needs_mask):
    x = x_ref[...].astype(jnp.float32)
    rows, lanes = x.shape
    neg_inf = x == -jnp.inf
    if needs_mask:
        flat = (jax.lax.broadcasted_iota(jnp.int32, (rows, lanes), 0) * lanes
                + jax.lax.broadcasted_iota(jnp.int32, (rows, lanes), 1))
        valid = flat < n
        drop = jnp.logical_or(neg_inf, jnp.logical_not(valid))
        kc = jnp.logical_and(neg_inf, valid)
    else:
        drop = neg_inf
        kc = neg_inf
    xf = jnp.where(drop, 0.0, x)
    xm = jnp.where(drop, jnp.inf, x)
    alpha, beta, fill_out = _finalize(
        jnp.sum(xf, keepdims=True), jnp.sum(xf * xf, keepdims=True),
        jnp.min(xm, keepdims=True),
        jnp.sum(kc.astype(jnp.float32), keepdims=True),
        n=n, scale=scale)
    o_ref[...] = jnp.where(neg_inf, fill_out,
                           x * alpha + beta).astype(o_ref.dtype)


# ----------------------------------------------------------------------------
# Wrapper
# ----------------------------------------------------------------------------
def gaussian_normalization(x, min_val=-0.1, max_val=0.1):
    """JAX/Pallas equivalent of GaussianNormalization.forward."""
    orig_shape = x.shape
    orig_dtype = x.dtype
    n = int(x.size)
    if n == 0:
        return x
    scale = float(max_val - min_val) / 2.0

    rows = -(-n // _LANE)
    padded = rows * _LANE
    ragged = padded != n               # only non-128-aligned sizes pad / slice

    x_flat = x.reshape(-1)
    if ragged:
        # TODO(synk): this alignment pad (and the matching output slice) is a
        # full XLA copy; it is only hit when x.size % 128 != 0.
        x_flat = jnp.pad(x_flat, (0, padded - n))
    slab = x_flat.reshape(rows, _LANE)           # free bitcast when not ragged

    itemsize = jnp.dtype(orig_dtype).itemsize

    if padded * itemsize <= _SMALL_LIMIT_BYTES:
        # ---- single pass: stats + normalize in one kernel --------------------
        out = pl.pallas_call(
            functools.partial(_fused_small_kernel, n=n, scale=scale,
                              needs_mask=ragged),
            out_shape=jax.ShapeDtypeStruct((rows, _LANE), orig_dtype),
            compiler_params=pltpu.CompilerParams(
                vmem_limit_bytes=_VMEM_LIMIT_BYTES),
        )(slab)
    else:
        # ---- tiled two-pass path ---------------------------------------------
        sub_mult = max(_SUBLANE, 32 // itemsize)        # 8 f32 / 16 bf16 / 32 i8
        tile_rows = max(sub_mult,
                        (_TILE_BYTES // (_LANE * itemsize)) // sub_mult * sub_mult)
        tile_rows = min(tile_rows, -(-rows // sub_mult) * sub_mult)
        num_tiles = -(-rows // tile_rows)
        tiles_per_core = -(-num_tiles // 2)
        has_edge = (n % (tile_rows * _LANE) != 0) or (num_tiles != 2 * tiles_per_core)
        last_tile = num_tiles - 1

        def tile_map(c, i):
            # clamp so phantom steps re-read a valid block (masked to zero).
            return (jnp.minimum(c * tiles_per_core + i, last_tile), 0)

        acc_shape = jax.ShapeDtypeStruct((2, _SUBLANE, _LANE), jnp.float32)
        acc_out_spec = pl.BlockSpec((1, _SUBLANE, _LANE), lambda c, i: (c, 0, 0))
        stats = pl.pallas_call(
            functools.partial(_stats_kernel, n_valid=n, tile_rows=tile_rows,
                              tiles_per_core=tiles_per_core,
                              num_tiles=num_tiles, has_edge=has_edge),
            out_shape=(acc_shape, acc_shape, acc_shape, acc_shape),
            grid_spec=pltpu.PrefetchScalarGridSpec(
                num_scalar_prefetch=0,
                grid=(2, tiles_per_core),
                in_specs=[pl.BlockSpec((tile_rows, _LANE), tile_map)],
                out_specs=[acc_out_spec] * 4),
            compiler_params=pltpu.CompilerParams(
                dimension_semantics=("parallel", "arbitrary"),
                vmem_limit_bytes=_VMEM_LIMIT_BYTES),
        )(slab)

        acc_in_spec = pl.BlockSpec((2, _SUBLANE, _LANE), lambda i: (0, 0, 0))
        out = pl.pallas_call(
            functools.partial(_normalize_kernel, n=n, scale=scale),
            out_shape=jax.ShapeDtypeStruct((rows, _LANE), orig_dtype),
            grid_spec=pltpu.PrefetchScalarGridSpec(
                num_scalar_prefetch=0,
                grid=(num_tiles,),
                in_specs=[acc_in_spec] * 4
                         + [pl.BlockSpec((tile_rows, _LANE), lambda i: (i, 0))],
                out_specs=pl.BlockSpec((tile_rows, _LANE), lambda i: (i, 0))),
            compiler_params=pltpu.CompilerParams(
                dimension_semantics=("parallel",),
                vmem_limit_bytes=_VMEM_LIMIT_BYTES),
        )(*stats, slab)

    out_flat = out.reshape(-1)
    if ragged:
        out_flat = out_flat[:n]
    return out_flat.reshape(orig_shape)


def _reference(x, min_val=-0.1, max_val=0.1):
    # pure-JAX reference mirroring the PyTorch module
    mask = x != -jnp.inf
    fill = jnp.where(jnp.any(mask), jnp.min(jnp.where(mask, x, jnp.inf)), 0.0)
    xr = jnp.where(mask, x, fill)
    mean = jnp.mean(xr)
    std = jnp.sqrt(jnp.sum((xr - mean) ** 2) / (xr.size - 1))
    return (xr - mean) / (std + 1e-07) * (max_val - min_val) / 2.0


if __name__ == "__main__":
    key = jax.random.PRNGKey(0)
    k1, k2, k3 = jax.random.split(key, 3)

    # (a) small, 128-aligned size -> single-pass fast path
    x1 = jax.random.normal(k1, (2, 4, 16, 16), dtype=jnp.float32)
    x1 = x1.at[0, 0, 0, :5].set(-jnp.inf)
    x1 = x1.at[1, 3, 7, 10].set(-jnp.inf)

    # (b) small, ragged size (not a multiple of 128) -> fast path + tail mask
    x2 = jax.random.normal(k2, (3, 5, 41), dtype=jnp.float32) * 2.0 + 0.5
    x2 = x2.at[0, 0, 0].set(-jnp.inf)

    # (c) above the fast-path threshold, ragged, odd tile count -> tiled path
    #     (exercises the 2-core split, edge-tile masking and phantom tiles)
    x3 = jax.random.normal(k3, (5, 460, 461), dtype=jnp.float32)
    x3 = x3.at[0, 0, :3].set(-jnp.inf)

    for x, tol in ((x1, 2e-5), (x2, 2e-5), (x3, 5e-5)):
        y = jax.block_until_ready(gaussian_normalization(x))
        y_ref = _reference(x)
        assert y.shape == x.shape and y.dtype == x.dtype
        err = float(jnp.max(jnp.abs(y - y_ref)))
        assert bool(jnp.allclose(y, y_ref, atol=tol, rtol=tol)), err
    print("KERNEL_OK")
</pallas_src>

<mosaic_0001>
module attributes {stable_mosaic.version = 11 : i64} {
  func.func @_fused_small_kernel(%arg0: memref<16x128xf32, #tpu.memory_space<vmem>>, %arg1: memref<16x128xf32, #tpu.memory_space<vmem>>) attributes {dimension_semantics = [], scalar_prefetch = 0 : i64, scratch_operands = 0 : i64, tpu.core_type = #tpu.core_type<tc>} {
    %c0 = arith.constant 0 : index
    %c0_0 = arith.constant 0 : index
    %0 = vector.load %arg0[%c0, %c0_0] : memref<16x128xf32, #tpu.memory_space<vmem>>, vector<16x128xf32>
    %cst = arith.constant 0xFF800000 : f32
    %1 = vector.broadcast %cst : f32 to vector<16x128xf32>
    %2 = arith.cmpf oeq, %0, %1 : vector<16x128xf32>
    %cst_1 = arith.constant 0.000000e+00 : f32
    %3 = vector.broadcast %cst_1 : f32 to vector<16x128xf32>
    %4 = arith.select %2, %3, %0 : vector<16x128xi1>, vector<16x128xf32>
    %cst_2 = arith.constant 0x7F800000 : f32
    %5 = vector.broadcast %cst_2 : f32 to vector<16x128xf32>
    %6 = arith.select %2, %5, %0 : vector<16x128xi1>, vector<16x128xf32>
    %7 = vector.shape_cast %4 : vector<16x128xf32> to vector<1x16x128xf32>
    %cst_3 = arith.constant dense<0.000000e+00> : vector<1xf32>
    %8 = vector.multi_reduction <add>, %7, %cst_3 [1, 2] : vector<1x16x128xf32> to vector<1xf32>
    %9 = vector.shape_cast %8 : vector<1xf32> to vector<1x1x1xf32>
    %10 = vector.extract %9[0, 0, 0] : f32 from vector<1x1x1xf32>
    %11 = vector.broadcast %10 : f32 to vector<1x1xf32>
    %12 = arith.mulf %4, %4 : vector<16x128xf32>
    %13 = vector.shape_cast %12 : vector<16x128xf32> to vector<1x16x128xf32>
    %cst_4 = arith.constant dense<0.000000e+00> : vector<1xf32>
    %14 = vector.multi_reduction <add>, %13, %cst_4 [1, 2] : vector<1x16x128xf32> to vector<1xf32>
    %15 = vector.shape_cast %14 : vector<1xf32> to vector<1x1x1xf32>
    %16 = vector.extract %15[0, 0, 0] : f32 from vector<1x1x1xf32>
    %17 = vector.broadcast %16 : f32 to vector<1x1xf32>
    %18 = vector.shape_cast %6 : vector<16x128xf32> to vector<1x16x128xf32>
    %cst_5 = arith.constant dense<0x7F800000> : vector<1xf32>
    %19 = vector.multi_reduction <minimumf>, %18, %cst_5 [1, 2] : vector<1x16x128xf32> to vector<1xf32>
    %20 = vector.shape_cast %19 : vector<1xf32> to vector<1x1x1xf32>
    %21 = vector.extract %20[0, 0, 0] : f32 from vector<1x1x1xf32>
    %22 = vector.broadcast %21 : f32 to vector<1x1xf32>
    %23 = arith.extui %2 : vector<16x128xi1> to vector<16x128xi32>
    %24 = arith.sitofp %23 : vector<16x128xi32> to vector<16x128xf32>
    %25 = vector.shape_cast %24 : vector<16x128xf32> to vector<1x16x128xf32>
    %cst_6 = arith.constant dense<0.000000e+00> : vector<1xf32>
    %26 = vector.multi_reduction <add>, %25, %cst_6 [1, 2] : vector<1x16x128xf32> to vector<1xf32>
    %27 = vector.shape_cast %26 : vector<1xf32> to vector<1x1x1xf32>
    %28 = vector.extract %27[0, 0, 0] : f32 from vector<1x1x1xf32>
    %29 = vector.broadcast %28 : f32 to vector<1x1xf32>
    %cst_7 = arith.constant 2.048000e+03 : f32
    %30 = vector.broadcast %cst_7 : f32 to vector<1x1xf32>
    %31 = arith.cmpf olt, %29, %30 : vector<1x1xf32>
    %cst_8 = arith.constant 0.000000e+00 : f32
    %32 = vector.broadcast %cst_8 : f32 to vector<1x1xf32>
    %33 = arith.select %31, %22, %32 : vector<1x1xi1>, vector<1x1xf32>
    %34 = arith.mulf %29, %33 : vector<1x1xf32>
    %35 = arith.addf %11, %34 : vector<1x1xf32>
    %36 = arith.mulf %29, %33 : vector<1x1xf32>
    %37 = arith.mulf %36, %33 : vector<1x1xf32>
    %38 = arith.addf %17, %37 : vector<1x1xf32>
    %cst_9 = arith.constant 4.8828125E-4 : f32
    %39 = vector.broadcast %cst_9 : f32 to vector<1x1xf32>
    %40 = arith.mulf %35, %39 : vector<1x1xf32>
    %cst_10 = arith.constant 2.048000e+03 : f32
    %41 = vector.broadcast %cst_10 : f32 to vector<1x1xf32>
    %42 = arith.mulf %41, %40 : vector<1x1xf32>
    %43 = arith.mulf %42, %40 : vector<1x1xf32>
    %44 = arith.subf %38, %43 : vector<1x1xf32>
    %cst_11 = arith.constant 0.000000e+00 : f32
    %45 = vector.broadcast %cst_11 : f32 to vector<1x1xf32>
    %46 = arith.maximumf %44, %45 : vector<1x1xf32>
    %cst_12 = arith.constant 4.88519785E-4 : f32
    %47 = vector.broadcast %cst_12 : f32 to vector<1x1xf32>
    %48 = arith.mulf %46, %47 : vector<1x1xf32>
    %49 = math.sqrt %48 : vector<1x1xf32>
    %cst_13 = arith.constant 1.000000e-07 : f32
    %50 = vector.broadcast %cst_13 : f32 to vector<1x1xf32>
    %51 = arith.addf %49, %50 : vector<1x1xf32>
    %cst_14 = arith.constant 1.000000e-01 : f32
    %52 = vector.broadcast %cst_14 : f32 to vector<1x1xf32>
    %53 = arith.divf %52, %51 : vector<1x1xf32>
    %cst_15 = arith.constant 0.000000e+00 : f32
    %54 = vector.broadcast %cst_15 : f32 to vector<1x1xf32>
    %55 = arith.subf %54, %40 : vector<1x1xf32>
    %56 = arith.mulf %55, %53 : vector<1x1xf32>
    %57 = arith.subf %33, %40 : vector<1x1xf32>
    %58 = arith.mulf %57, %53 : vector<1x1xf32>
    %59 = vector.broadcast %53 : vector<1x1xf32> to vector<16x128xf32>
    %60 = arith.mulf %0, %59 : vector<16x128xf32>
    %61 = vector.broadcast %56 : vector<1x1xf32> to vector<16x128xf32>
    %62 = arith.addf %60, %61 : vector<16x128xf32>
    %63 = vector.shape_cast %58 : vector<1x1xf32> to vector<1x1xf32>
    %64 = vector.broadcast %63 : vector<1x1xf32> to vector<16x128xf32>
    %65 = arith.select %2, %64, %62 : vector<16x128xi1>, vector<16x128xf32>
    %c0_16 = arith.constant 0 : index
    %c0_17 = arith.constant 0 : index
    %66 = vector.load %arg1[%c0_16, %c0_17] : memref<16x128xf32, #tpu.memory_space<vmem>>, vector<16x128xf32>
    tpu.vector_store %arg1[%c0_16, %c0_17], %65 {strides = array<i32>} : memref<16x128xf32, #tpu.memory_space<vmem>>, vector<16x128xf32>,
    return
  }
}

</mosaic_0001>

<bundles_post_ra>
// kernel: tpu_custom_call.1
= control target key start
LH: loop header
LB: loop body
LE: loop exit
PB: predicated region body
PF: predicated region fallthrough
CT: control target
= control target key end

     0   :  { %6 = vsyncpa [#allocation3], 0  ;;  %s272_s0 = inlined_call_operand.hbm [shape: f32[16,128], index: 0, kind: input, shape index: {}]   ;;  %s273_s1 = inlined_call_operand.hbm [shape: f32[16,128], index: 1, kind: output, shape index: {}]  }
   0x1   :  { %7 = vsyncpa [#allocation4], 0  ;;  %s199_s6 = smov [#allocation2]   ;;  %s151_s10 = scalar_lea.hbm %s272_s0, 256 }
   0x2   :  { %s13_s7 = sshll.u32 %s199_s6, 4  ;;  %p152_p0 = scmp.ne.s32.totalorder %s272_s0, %s151_s10  ;;  %s14_s7 = int_to_ptr.vmem [resolvable:$true] %s13_s7 }
   0x3   :  { %p155_p1 = scmp.lt.u32.totalorder %s151_s10, %s272_s0 }
   0x5   :  { %p157_p2 = pnand %p155_p1, %p152_p0 }
   0x7   :  { %160 = shalt.err (!%p157_p2)
}
   0x8   :  { %s161_s15 = scalar_lea.vmem %s14_s7, 256  ;;  %p166_p4 = scmp.lt.s32.totalorder %s14_s7, %s14_s7 }
   0x9   :  { %p162_p3 = scmp.ne.s32.totalorder %s14_s7, %s161_s15  ;;  %p167_p5 = scmp.lt.s32.totalorder %s161_s15, %s161_s15 }
   0xb   :  { %p168_p6 = por %p167_p5, %p166_p4 }
   0xd   :  { %p169_p7 = pnand %p168_p6, %p162_p3 }
   0xf   :  { %172 = shalt.err (!%p169_p7)
}
  0x10   :  { %s200_s16 = smov 128   ;;  %s201_s17 = smov 8  }
  0x11   :  { %19 = dma.hbm_to_vmem [thread:$0]  %s272_s0, 256, %s14_s7, [#allocation3], %s200_s16, %s200_s16, %s201_s17  }
  0x12   :  { %195 = dma.done.wait [#allocation3], 256  }
  0x13   :  { %196 = vsyncadd [#allocation3], 4294967040  ;;  %v229_v0 = vld [vmem:[#allocation2] sm:$0xff]  ;;  %v231_v1 = vld [vmem:[#allocation2 + $0x8] sm:$0xff]  ;;  %v202_v10 = vmov 0.0   ;;  %s203_s23 = smov [#allocation5]  }
  0x14   :  { %vm25_vm0 = vcmp.eq.f32.partialorder %v229_v0, -inf  ;;  %vm26_vm1 = vcmp.eq.f32.partialorder %v231_v1, -inf  ;;  %s120_s24 = sshll.u32 %s203_s23, 4  ;;  %s121_s24 = int_to_ptr.vmem [resolvable:$true] %s120_s24 }
  0x15   :  { %v29_v2 = vsel %vm25_vm0, inf, %v229_v0  ;;  %v30_v3 = vsel %vm26_vm1, inf, %v231_v1  ;;  %v27_v4 = vsel %vm25_vm0, 0.0, %v229_v0  ;;  %v28_v5 = vsel %vm26_vm1, 0.0, %v231_v1  ;;  %s173_s25 = scalar_lea.vmem %s121_s24, 256  ;;  %p178_p9 = scmp.lt.s32.totalorder %s121_s24, %s121_s24 }
  0x16   :  { %v55_v6 = vmin.f32 %v29_v2, %v30_v3  ;;  %v31_v7 = vadd.f32 %v28_v5, %v27_v4  ;;  %v42_v8 = vmul.f32 %v27_v4, %v27_v4  ;;  %v43_v9 = vmul.f32 %v28_v5, %v28_v5  ;;  %p174_p8 = scmp.ne.s32.totalorder %s121_s24, %s173_s25  ;;  %p179_p10 = scmp.lt.s32.totalorder %s173_s25, %s173_s25 }
  0x17   :  { %v132_v11 = vsel %vm25_vm0, 1.0, %v202_v10  ;;  %v133_v12 = vsel %vm26_vm1, 1.0, %v202_v10 }
  0x18   :  { %56 = vmin.xlane.f32.xlu1 %v55_v6  ;;  %32 = vadd.xlane.f32.xlu0 %v31_v7  ;;  %v70_v13 = vadd.f32 %v133_v12, %v132_v11  ;;  %v44_v14 = vadd.f32 %v43_v9, %v42_v8  ;;  %p180_p11 = por %p179_p10, %p178_p9 }
  0x1a   :  { %p181_p12 = pnand %p180_p11, %p174_p8 }
  0x1c   :  { %71 = vadd.xlane.f32.xlu1 %v70_v13  ;;  %45 = vadd.xlane.f32.xlu0 %v44_v14 }
  0xa5   :  { %v57_v15 = vpop.xlane.xlu1 %56  ;;  %v33_v16 = vpop.xlane.xlu0 %32 }
  0xa6   :  { %v58_v17 = vrot.slane %v57_v15, 4  ;;  %v34_v18 = vrot.slane %v33_v16, 4 }
  0xa8   :  { %v59_v19 = vmin.f32 %v57_v15, %v58_v17  ;;  %v35_v20 = vadd.f32 %v34_v18, %v33_v16 }
  0xa9   :  { %v72_v21 = vpop.xlane.xlu1 %71  ;;  %v46_v22 = vpop.xlane.xlu0 %45 }
  0xaa   :  { %v60_v23 = vrot.slane %v59_v19, 2  ;;  %v36_v24 = vrot.slane %v35_v20, 2  ;;  %v73_v25 = vrot.slane %v72_v21, 4  ;;  %v47_v26 = vrot.slane %v46_v22, 4 }
  0xac   :  { %v74_v27 = vadd.f32 %v73_v25, %v72_v21  ;;  %v48_v28 = vadd.f32 %v47_v26, %v46_v22  ;;  %v37_v29 = vadd.f32 %v36_v24, %v35_v20  ;;  %v61_v30 = vmin.f32 %v59_v19, %v60_v23 }
  0xae   :  { %v75_v31 = vrot.slane %v74_v27, 2  ;;  %v49_v32 = vrot.slane %v48_v28, 2  ;;  %v38_v33 = vrot.slane %v37_v29, 1  ;;  %v62_v37 = vrot.slane %v61_v30, 1 }
  0xb0   :  { %v76_v34 = vadd.f32 %v75_v31, %v74_v27  ;;  %v50_v35 = vadd.f32 %v49_v32, %v48_v28  ;;  %v39_v36 = vadd.f32 %v38_v33, %v37_v29  ;;  %v63_v42 = vmin.f32 %v61_v30, %v62_v37 }
  0xb2   :  { %134 = vpush %v39_v36  ;;  %v51_v38 = vrot.slane %v50_v35, 1  ;;  %v77_v39 = vrot.slane %v76_v34, 1 }
  0xb4   :  { %v52_v40 = vadd.f32 %v51_v38, %v50_v35  ;;  %v78_v41 = vadd.f32 %v77_v39, %v76_v34 }
  0xb6   :  { %136 = vpush %v52_v40 }
  0xb7   :  { %138 = vpush %v63_v42 }
  0xb8   :  { %140 = vpush %v78_v41 }
  0xe3   :  { %s135_s0 = spop %134 }
  0xe4   :  { %v41_v47 = vstv %s135_s0 }
  0xe7   :  { %s137_s20 = spop %136 }
  0xe8   :  { %s139_s21 = spop %138  ;;  %v54_v52 = vstv %s137_s20 }
  0xe9   :  { %v65_v43 = vstv %s139_s21  ;;  %s141_s22 = spop %140 }
  0xea   :  { %v80_v44 = vstv %s141_s22 }
  0xeb   :  { %vm81_vm2 = vcmp.lt.f32.partialorder %v80_v44, 2048.0 }
  0xec   :  { %v82_v45 = vsel %vm81_vm2, %v65_v43, 0.0 }
  0xed   :  { %v83_v46 = vmul.f32 %v82_v45, %v80_v44 }
  0xef   :  { %v84_v48 = vadd.f32 %v83_v46, %v41_v47  ;;  %v85_v49 = vmul.f32 %v83_v46, %v82_v45 }
  0xf1   :  { %v87_v50 = vmul.f32 0.00048828125, %v84_v48  ;;  %v86_v53 = vadd.f32 %v85_v49, %v54_v52 }
  0xf3   :  { %v88_v51 = vmul.f32 2048.0, %v87_v50  ;;  %v103_v4 = vsub.f32 0.0, %v87_v50  ;;  %v105_v5 = vsub.f32 %v82_v45, %v87_v50 }
  0xf5   :  { %v89_v54 = vmul.f32 %v88_v51, %v87_v50 }
  0xf7   :  { %v90_v55 = vsub.f32 %v86_v53, %v89_v54 }
  0xf9   :  { %v91_v56 = vmax.f32 %v90_v55, 0.0 }
  0xfb   :  { %v92_v57 = vmul.f32 0.0004885198, %v91_v56 }
  0xfd   :  { %147 = vrsqrt.f32 %v92_v57  ;;  %vm95_vm3 = vcmp.eq.f32.partialorder %v92_v57, inf  ;;  %v98_v60 = vand.u32 2147483648, %v92_v57  ;;  %vm97_vm4 = vcmp.eq.f32.partialorder %v92_v57, 0.0 }
 0x107   :  { %v148_v58 = vpop.eup %147 }
 0x108   :  { %v94_v59 = vmul.f32 %v148_v58, %v92_v57 }
 0x10a   :  { %v96_v61 = vsel %vm95_vm3, %v92_v57, %v94_v59 }
 0x10b   :  { %v99_v62 = vsel %vm97_vm4, %v98_v60, %v96_v61 }
 0x10c   :  { %v100_v63 = vadd.f32 1e-07, %v99_v62 }
 0x10e   :  { %149 = vrcp.f32 %v100_v63 }
 0x118   :  { %v150_v2 = vpop.eup %149 }
 0x119   :  { %v102_v3 = vmul.f32 0.1, %v150_v2 }
 0x11b   :  { %v104_v6 = vmul.f32 %v103_v4, %v102_v3  ;;  %v107_v7 = vmul.f32 %v102_v3, %v229_v0  ;;  %v108_v8 = vmul.f32 %v102_v3, %v231_v1  ;;  %v106_v9 = vmul.f32 %v105_v5, %v102_v3 }
 0x11d   :  { %v109_v10 = vadd.f32 %v107_v7, %v104_v6  ;;  %v110_v11 = vadd.f32 %v108_v8, %v104_v6 }
 0x11f   :  { %v111_v12 = vsel %vm25_vm0, %v106_v9, %v109_v10  ;;  %v112_v13 = vsel %vm26_vm1, %v106_v9, %v110_v11 }
 0x120   :  { %113 = vst [vmem:[#allocation5] sm:$0xff] %v111_v12  ;;  %114 = vst [vmem:[#allocation5 + $0x8] sm:$0xff] %v112_v13 }
 0x121   :  { %184 = shalt.err (!%p181_p12)
}
 0x122   :  { %s185_s28 = scalar_lea.hbm %s273_s1, 256 }
 0x123   :  { %p186_p13 = scmp.ne.s32.totalorder %s273_s1, %s185_s28  ;;  %p189_p0 = scmp.lt.u32.totalorder %s185_s28, %s273_s1 }
 0x125   :  { %p191_p1 = pnand %p189_p0, %p186_p13 }
 0x127   :  { %194 = shalt.err (!%p191_p1)
}
 0x128   :  { %126 = dma.vmem_to_hbm [thread:$0]  %s121_s24, 256, %s273_s1, [#allocation4], %s200_s16, %s200_s16, %s201_s17  }
 0x129   :  { %197 = dma.done.wait [#allocation4], 256  }
 0x12a   :  { %198 = vsyncadd [#allocation4], 4294967040 }
 0x12b   :  { %130 = vsyncpa [#allocation3], 1 }
 0x12c   :  { %131 = vsyncpa [#allocation4], 1 }

</bundles_post_ra>
